<compile_context>
chip_gen: v7x
topology: tpu7x:2x2x1
jax: 0.10.0
libtpu: 0.0.40
codegen_flags: <defaults>
</compile_context>

<pallas_src>
import jax
import jax.numpy as jnp
from jax.experimental import pallas as pl
from jax.experimental.pallas import tpu as pltpu


def _round_up(v, m):
    return ((v + m - 1) // m) * m


def _min_sublane(dtype):
    return {4: 8, 2: 16, 1: 32}.get(jnp.dtype(dtype).itemsize, 8)


def _vmem_capacity_bytes():
    try:
        cap = getattr(pltpu.get_tpu_info(), "vmem_capacity_bytes", None)
        if cap:
            return int(cap)
    except Exception:
        pass
    return 64 << 20  # conservative fallback (v7x per-core physical VMEM)


def _moe_expert_kernel(mask_ref,        # SMEM (nt*E,) int32: tile i routed >=1 token to expert e
                       fetch_ref,       # SMEM (nt*E,) int32: expert block to fetch (unused in body)
                       x_ref,           # (tm, D)      token tile (compute dtype)
                       route_ref,       # (tm, 1)      f32 routing weight of expert e per token
                       w13_ref,         # (D, 2*th)    fused [w1 | w3] chunk of expert e
                       w2_ref,          # (th, D)      down-proj chunk of expert e
                       out_ref,         # (tm, D)
                       acc_ref):        # VMEM scratch (tm, D) f32
    del fetch_ref  # consumed by the index_maps only
    ti = pl.program_id(0)   # token tile (parallel)
    ei = pl.program_id(1)   # expert (reduction axis)
    hi = pl.program_id(2)   # hidden chunk (reduction axis)
    ne = pl.num_programs(1)
    nh = pl.num_programs(2)
    th = w2_ref.shape[0]

    @pl.when(jnp.logical_and(ei == 0, hi == 0))
    def _():
        acc_ref[...] = jnp.zeros_like(acc_ref)

    # Skip the matmuls when no token in this tile selected expert ei (decode/small-T win;
    # the weight DMA for these steps is already deduped via the fetch_e index_map).
    @pl.when(mask_ref[ti * ne + ei] > 0)
    def _():
        x = x_ref[...]                                                        # (tm, D)
        h13 = jnp.dot(x, w13_ref[...], preferred_element_type=jnp.float32)    # (tm, 2*th)
        h1 = h13[:, :th]
        h3 = h13[:, th:]
        act = (h1 * jax.nn.sigmoid(h1)) * h3                                  # SwiGLU (this chunk)
        # routing weight commutes through the w2 matmul; apply it on the small (tm, th) tile
        act = route_ref[...].astype(jnp.float32) * act
        acc_ref[...] += jnp.dot(act.astype(w2_ref.dtype), w2_ref[...],
                                preferred_element_type=jnp.float32)           # partial (tm, D)

    @pl.when(jnp.logical_and(ei == ne - 1, hi == nh - 1))
    def _():
        out_ref[...] = acc_ref[...].astype(out_ref.dtype)


def moe_forward(x, gate_w, w1, w3, w2, num_experts_per_tok, *,
                tm=256, th=None, compute_dtype=None):
    """MoeLayer.forward: x (T, D) -> (T, D).

    tm: token tile (rounded to the dtype sublane minimum; 256 default, 512 pays off on v5e
        prefill since weights are re-streamed once per token tile).
    th: expert-hidden chunk; None -> auto-sized from the device VMEM capacity
        (v7x f32 ~256, v7x bf16 ~512, v5e/v6e bf16 >=1024).
    compute_dtype: optional matmul dtype (e.g. jnp.bfloat16) — halves weight DMA bytes;
        accumulation and routing weights stay f32.
    """
    T, D = x.shape
    E, _, H = w1.shape
    out_dtype = x.dtype
    cdt = jnp.dtype(compute_dtype) if compute_dtype is not None else jnp.dtype(x.dtype)
    cbytes = cdt.itemsize
    obytes = jnp.dtype(out_dtype).itemsize

    # --- routing glue (plain JAX): gate logits -> top-k -> softmax -> dense route matrix ---
    gate_logits = jnp.dot(x, gate_w)                                          # (T, E)
    top_vals, top_idx = jax.lax.top_k(gate_logits, num_experts_per_tok)
    top_w = jax.nn.softmax(top_vals.astype(jnp.float32), axis=-1)             # f32 end-to-end
    route = jnp.zeros((T, E), jnp.float32)
    route = route.at[jnp.arange(T)[:, None], top_idx].set(top_w)              # 0 if not selected

    # --- tile sizing ---
    vmem_cap = _vmem_capacity_bytes()
    min_sub = max(_min_sublane(cdt), _min_sublane(out_dtype))
    tm_eff = _round_up(min(tm, _round_up(T, min_sub)), min_sub)
    if th is None:
        # keep double-buffered (w13 + w2) chunks around 45% of VMEM
        th = max(128, ((int(0.45 * vmem_cap) // (6 * D * cbytes)) // 128) * 128)
    th_eff = min(th, H)
    if th_eff < H:
        th_eff = max(128, _round_up(th_eff, 128))
    T_pad = _round_up(T, tm_eff)
    H_pad = _round_up(H, th_eff)
    nt, nh = T_pad // tm_eff, H_pad // th_eff

    # --- pad to tile multiples (padded tokens get zero routing weight -> contribute nothing) ---
    x_p = jnp.pad(x, ((0, T_pad - T), (0, 0))) if T_pad != T else x
    route_p = jnp.pad(route, ((0, T_pad - T), (0, 0))) if T_pad != T else route
    route_etk = route_p.T[:, :, None]                                         # (E, T_pad, 1) f32
    if H_pad != H:
        w1 = jnp.pad(w1, ((0, 0), (0, 0), (0, H_pad - H)))
        w3 = jnp.pad(w3, ((0, 0), (0, 0), (0, H_pad - H)))
        w2 = jnp.pad(w2, ((0, 0), (0, H_pad - H), (0, 0)))

    # Fuse w1/w3 so chunk h of the last axis is [w1[..., h*th:(h+1)*th] | w3[..., ...]].
    w13 = jnp.concatenate([w1.reshape(E, D, nh, th_eff),
                           w3.reshape(E, D, nh, th_eff)], axis=3).reshape(E, D, 2 * H_pad)
    w13 = w13.astype(cdt)
    w2c = w2.astype(cdt)
    x_c = x_p.astype(cdt)

    # --- per-(tile, expert) activity mask + DMA-dedup fetch table (flat 1-D SMEM) ---
    tile_mask = jnp.any(route_p.reshape(nt, tm_eff, E) > 0, axis=1)
    tile_mask = tile_mask.reshape(-1).astype(jnp.int32)                       # (nt*E,)
    pos = jnp.arange(nt * E, dtype=jnp.int32)
    last_active = jax.lax.cummax(jnp.where(tile_mask > 0, pos, -1), axis=0)
    fetch_e = jnp.where(last_active >= 0, last_active % E, 0).astype(jnp.int32)

    def x_map(i, e, h, mask, fe):
        return (i, 0)

    def route_map(i, e, h, mask, fe):
        return (e, i, 0)

    def w13_map(i, e, h, mask, fe):
        flat = i * E + e
        a = (mask[flat] > 0).astype(jnp.int32)
        # inactive step: repeat the previously fetched (expert, last-h) block -> DMA elided
        return (fe[flat], 0, a * h + (1 - a) * (nh - 1))

    def w2_map(i, e, h, mask, fe):
        flat = i * E + e
        a = (mask[flat] > 0).astype(jnp.int32)
        return (fe[flat], a * h + (1 - a) * (nh - 1), 0)

    # --- VMEM budget (clamped to physical capacity) + cost hint ---
    tile_vmem = (2 * tm_eff * D * cbytes            # x (double-buffered)
                 + 2 * tm_eff * 4                   # route column
                 + 2 * D * (2 * th_eff) * cbytes    # fused w13 chunk
                 + 2 * th_eff * D * cbytes          # w2 chunk
                 + 2 * tm_eff * D * obytes          # out
                 + tm_eff * D * 4)                  # f32 accumulator scratch
    vmem_limit = int(min(max(tile_vmem + (8 << 20), 32 << 20), vmem_cap - (4 << 20)))

    cost = pl.CostEstimate(
        flops=6 * T_pad * E * D * H_pad,            # dense upper bound: up-proj + down-proj
        transcendentals=T_pad * E * H_pad,          # sigmoid in SwiGLU
        bytes_accessed=(nt * E * 3 * D * H_pad * cbytes
                        + T_pad * D * (cbytes + obytes) + E * T_pad * 4),
    )

    grid = (nt, E, nh)  # token tiles parallel; expert + hidden chunks are reduction axes
    out = pl.pallas_call(
        _moe_expert_kernel,
        out_shape=jax.ShapeDtypeStruct((T_pad, D), out_dtype),
        grid_spec=pltpu.PrefetchScalarGridSpec(
            num_scalar_prefetch=2,
            grid=grid,
            in_specs=[
                pl.BlockSpec((tm_eff, D), x_map),                    # x tile
                pl.BlockSpec((None, tm_eff, 1), route_map),          # route column of expert e
                pl.BlockSpec((None, D, 2 * th_eff), w13_map),        # fused w1|w3 chunk
                pl.BlockSpec((None, th_eff, D), w2_map),             # w2 chunk
            ],
            out_specs=pl.BlockSpec((tm_eff, D), x_map),
            scratch_shapes=[pltpu.VMEM((tm_eff, D), jnp.float32)],
        ),
        compiler_params=pltpu.CompilerParams(
            dimension_semantics=("parallel", "arbitrary", "arbitrary"),
            vmem_limit_bytes=vmem_limit),
        cost_estimate=cost,
    )(tile_mask, fetch_e, x_c, route_etk, w13, w2c)
    return out[:T]


def moe_reference(x, gate_w, w1, w3, w2, k):
    """Pure-JAX reference mirroring the PyTorch loop (dense formulation)."""
    logits = jnp.dot(x, gate_w)
    top_vals, top_idx = jax.lax.top_k(logits, k)
    weights = jax.nn.softmax(top_vals.astype(jnp.float32), axis=-1).astype(x.dtype)
    E = w1.shape[0]
    results = jnp.zeros_like(x)
    for i in range(E):
        y = jnp.dot(jax.nn.silu(jnp.dot(x, w1[i])) * jnp.dot(x, w3[i]), w2[i])
        w = jnp.sum(jnp.where(top_idx == i, weights, 0.0), axis=-1, keepdims=True)
        results = results + w * y
    return results


if __name__ == "__main__":
    def make_case(key, T, D, H, E, dtype=jnp.float32):
        kx, kg, k1, k3, k2 = jax.random.split(key, 5)
        x = jax.random.normal(kx, (T, D), dtype)
        gate_w = jax.random.normal(kg, (D, E), dtype) * 0.1   # gate: Linear(D, E, bias=False)
        w1 = jax.random.normal(k1, (E, D, H), dtype) * 0.1    # experts[e].w1
        w3 = jax.random.normal(k3, (E, D, H), dtype) * 0.1    # experts[e].w3
        w2 = jax.random.normal(k2, (E, H, D), dtype) * 0.1    # experts[e].w2
        return x, gate_w, w1, w3, w2

    key = jax.random.PRNGKey(0)
    k_a, k_b, k_c = jax.random.split(key, 3)

    # Case 1: tiny config, MoeArgs(num_experts=4, num_experts_per_tok=2), defaults.
    x, gw, w1, w3, w2 = make_case(k_a, T=8, D=32, H=64, E=4)
    out = jax.block_until_ready(moe_forward(x, gw, w1, w3, w2, 2))
    ref = jax.block_until_ready(moe_reference(x, gw, w1, w3, w2, 2))
    assert out.shape == x.shape and out.dtype == x.dtype
    assert jnp.allclose(out, ref, rtol=2e-3, atol=2e-3), "case 1 mismatch vs reference"

    # Case 2: T-padding (T % tm != 0), multiple token tiles, H chunking (nh=2), fused w1|w3.
    x, gw, w1, w3, w2 = make_case(k_b, T=40, D=128, H=256, E=4)
    out = jax.block_until_ready(moe_forward(x, gw, w1, w3, w2, 2, tm=16, th=128))
    ref = jax.block_until_ready(moe_reference(x, gw, w1, w3, w2, 2))
    assert out.shape == x.shape and out.dtype == x.dtype
    assert jnp.allclose(out, ref, rtol=2e-3, atol=2e-3), "case 2 mismatch vs reference"

    # Case 3: E=8, k=1 — some experts receive no token, exercising the compute-skip mask and
    # the fetch_e DMA-dedup index_map path.
    x, gw, w1, w3, w2 = make_case(k_c, T=8, D=32, H=64, E=8)
    out = jax.block_until_ready(moe_forward(x, gw, w1, w3, w2, 1))
    ref = jax.block_until_ready(moe_reference(x, gw, w1, w3, w2, 1))
    assert out.shape == x.shape and out.dtype == x.dtype
    assert jnp.allclose(out, ref, rtol=2e-3, atol=2e-3), "case 3 mismatch vs reference"

    # Case 4: bf16 compute path (f32 accumulation/routing) vs f32 reference.
    x, gw, w1, w3, w2 = make_case(k_b, T=40, D=128, H=256, E=4)
    out = jax.block_until_ready(
        moe_forward(x, gw, w1, w3, w2, 2, compute_dtype=jnp.bfloat16))
    ref = jax.block_until_ready(moe_reference(x, gw, w1, w3, w2, 2))
    rel = jnp.linalg.norm(out - ref) / (jnp.linalg.norm(ref) + 1e-12)
    assert out.shape == x.shape and out.dtype == x.dtype
    assert rel < 5e-2, f"case 4 (bf16 compute) relative error too large: {rel}"

    print("KERNEL_OK")
</pallas_src>

<mosaic_0001>
module attributes {stable_mosaic.version = 11 : i64} {
  func.func @_moe_expert_kernel(%arg0: i32, %arg1: i32, %arg2: i32, %arg3: memref<4xi32, #tpu.memory_space<smem>>, %arg4: memref<4xi32, #tpu.memory_space<smem>>, %arg5: memref<8x32xf32, #tpu.memory_space<vmem>>, %arg6: memref<1x8x1xf32, #tpu.memory_space<vmem>>, %arg7: memref<1x32x128xf32, #tpu.memory_space<vmem>>, %arg8: memref<1x64x32xf32, #tpu.memory_space<vmem>>, %arg9: memref<8x32xf32, #tpu.memory_space<vmem>>, %arg10: memref<8x32xf32, #tpu.memory_space<vmem>>) attributes {dimension_semantics = [#tpu.dimension_semantics<parallel>, #tpu.dimension_semantics<arbitrary>, #tpu.dimension_semantics<arbitrary>], iteration_bounds = array<i64: 1, 4, 1>, scalar_prefetch = 2 : i64, scratch_operands = 1 : i64, tpu.core_type = #tpu.core_type<tc>, window_params = [{transform_indices = @transform_0, window_bounds = array<i64: 8, 32>}, {transform_indices = @transform_1, window_bounds = array<i64: 1, 8, 1>}, {transform_indices = @transform_2, window_bounds = array<i64: 1, 32, 128>}, {transform_indices = @transform_3, window_bounds = array<i64: 1, 64, 32>}, {transform_indices = @transform_4, window_bounds = array<i64: 8, 32>}]} {
    %c0_i32 = arith.constant 0 : i32
    %0 = arith.cmpi eq, %arg1, %c0_i32 : i32
    %c0_i32_0 = arith.constant 0 : i32
    %1 = arith.cmpi eq, %arg2, %c0_i32_0 : i32
    %2 = arith.andi %0, %1 : i1
    %3 = arith.extui %2 : i1 to i32
    %c0_i32_1 = arith.constant 0 : i32
    %4 = arith.cmpi ne, %3, %c0_i32_1 : i32
    scf.if %4 {
      %cst = arith.constant 0.000000e+00 : f32
      %17 = vector.broadcast %cst : f32 to vector<8x32xf32>
      %c0 = arith.constant 0 : index
      %c0_6 = arith.constant 0 : index
      %18 = vector.load %arg10[%c0, %c0_6] : memref<8x32xf32, #tpu.memory_space<vmem>>, vector<8x32xf32>
      tpu.vector_store %arg10[%c0, %c0_6], %17 {strides = array<i32>} : memref<8x32xf32, #tpu.memory_space<vmem>>, vector<8x32xf32>,
    } else {
    }
    %c4_i32 = arith.constant 4 : i32
    %5 = arith.muli %arg0, %c4_i32 : i32
    %6 = arith.addi %5, %arg1 : i32
    %7 = arith.index_cast %6 : i32 to index
    %8 = memref.load %arg3[%7] : memref<4xi32, #tpu.memory_space<smem>>
    %c0_i32_2 = arith.constant 0 : i32
    %9 = arith.cmpi sgt, %8, %c0_i32_2 : i32
    %10 = arith.extui %9 : i1 to i32
    %c0_i32_3 = arith.constant 0 : i32
    %11 = arith.cmpi ne, %10, %c0_i32_3 : i32
    scf.if %11 {
      %c0 = arith.constant 0 : index
      %c0_6 = arith.constant 0 : index
      %17 = vector.load %arg5[%c0, %c0_6] : memref<8x32xf32, #tpu.memory_space<vmem>>, vector<8x32xf32>
      %c0_7 = arith.constant 0 : index
      %c0_8 = arith.constant 0 : index
      %c0_9 = arith.constant 0 : index
      %18 = vector.load %arg7[%c0_7, %c0_8, %c0_9] : memref<1x32x128xf32, #tpu.memory_space<vmem>>, vector<1x32x128xf32>
      %19 = vector.shape_cast %18 : vector<1x32x128xf32> to vector<32x128xf32>
      %cst = arith.constant dense<0.000000e+00> : vector<8x128xf32>
      %20 = tpu.matmul %17, %19, %cst {dimension_numbers = #tpu.dot_dimension_numbers<[1], [0], [0], [1], [0, 0, 1, 1], [], []>} : vector<8x32xf32>, vector<32x128xf32>, vector<8x128xf32> -> vector<8x128xf32>
      %21 = vector.extract_strided_slice %20 {offsets = [0, 0], sizes = [8, 64], strides = [1, 1]} : vector<8x128xf32> to vector<8x64xf32>
      %22 = vector.extract_strided_slice %20 {offsets = [0, 64], sizes = [8, 64], strides = [1, 1]} : vector<8x128xf32> to vector<8x64xf32>
      %23 = arith.negf %21 : vector<8x64xf32>
      %24 = math.exp %23 : vector<8x64xf32>
      %cst_10 = arith.constant 1.000000e+00 : f32
      %25 = vector.broadcast %cst_10 : f32 to vector<8x64xf32>
      %26 = arith.addf %25, %24 : vector<8x64xf32>
      %27 = arith.divf %25, %26 : vector<8x64xf32>
      %28 = arith.mulf %21, %27 : vector<8x64xf32>
      %29 = arith.mulf %28, %22 : vector<8x64xf32>
      %c0_11 = arith.constant 0 : index
      %c0_12 = arith.constant 0 : index
      %c0_13 = arith.constant 0 : index
      %30 = vector.load %arg6[%c0_11, %c0_12, %c0_13] : memref<1x8x1xf32, #tpu.memory_space<vmem>>, vector<1x8x1xf32>
      %31 = vector.shape_cast %30 : vector<1x8x1xf32> to vector<8x1xf32>
      %32 = vector.broadcast %31 : vector<8x1xf32> to vector<8x64xf32>
      %33 = arith.mulf %32, %29 : vector<8x64xf32>
      %c0_14 = arith.constant 0 : index
      %c0_15 = arith.constant 0 : index
      %34 = vector.load %arg10[%c0_14, %c0_15] : memref<8x32xf32, #tpu.memory_space<vmem>>, vector<8x32xf32>
      %c0_16 = arith.constant 0 : index
      %c0_17 = arith.constant 0 : index
      %c0_18 = arith.constant 0 : index
      %35 = vector.load %arg8[%c0_16, %c0_17, %c0_18] : memref<1x64x32xf32, #tpu.memory_space<vmem>>, vector<1x64x32xf32>
      %36 = vector.shape_cast %35 : vector<1x64x32xf32> to vector<64x32xf32>
      %cst_19 = arith.constant dense<0.000000e+00> : vector<8x32xf32>
      %37 = tpu.matmul %33, %36, %cst_19 {dimension_numbers = #tpu.dot_dimension_numbers<[1], [0], [0], [1], [0, 0, 1, 1], [], []>} : vector<8x64xf32>, vector<64x32xf32>, vector<8x32xf32> -> vector<8x32xf32>
      %38 = arith.addf %34, %37 : vector<8x32xf32>
      %c0_20 = arith.constant 0 : index
      %c0_21 = arith.constant 0 : index
      %39 = vector.load %arg10[%c0_20, %c0_21] : memref<8x32xf32, #tpu.memory_space<vmem>>, vector<8x32xf32>
      tpu.vector_store %arg10[%c0_20, %c0_21], %38 {strides = array<i32>} : memref<8x32xf32, #tpu.memory_space<vmem>>, vector<8x32xf32>,
    } else {
    }
    %c3_i32 = arith.constant 3 : i32
    %12 = arith.cmpi eq, %arg1, %c3_i32 : i32
    %c0_i32_4 = arith.constant 0 : i32
    %13 = arith.cmpi eq, %arg2, %c0_i32_4 : i32
    %14 = arith.andi %12, %13 : i1
    %15 = arith.extui %14 : i1 to i32
    %c0_i32_5 = arith.constant 0 : i32
    %16 = arith.cmpi ne, %15, %c0_i32_5 : i32
    scf.if %16 {
      %c0 = arith.constant 0 : index
      %c0_6 = arith.constant 0 : index
      %17 = vector.load %arg10[%c0, %c0_6] : memref<8x32xf32, #tpu.memory_space<vmem>>, vector<8x32xf32>
      %c0_7 = arith.constant 0 : index
      %c0_8 = arith.constant 0 : index
      %18 = vector.load %arg9[%c0_7, %c0_8] : memref<8x32xf32, #tpu.memory_space<vmem>>, vector<8x32xf32>
      tpu.vector_store %arg9[%c0_7, %c0_8], %17 {strides = array<i32>} : memref<8x32xf32, #tpu.memory_space<vmem>>, vector<8x32xf32>,
    } else {
    }
    return
  }
  func.func @transform_0(%arg0: i32, %arg1: i32, %arg2: i32, %arg3: memref<4xi32, #tpu.memory_space<smem>>, %arg4: memref<4xi32, #tpu.memory_space<smem>>) -> (i32, i32) {
    %c0_i32 = arith.constant 0 : i32
    %c0_i32_0 = arith.constant 0 : i32
    return %arg0, %c0_i32 : i32, i32
  }
  func.func @transform_1(%arg0: i32, %arg1: i32, %arg2: i32, %arg3: memref<4xi32, #tpu.memory_space<smem>>, %arg4: memref<4xi32, #tpu.memory_space<smem>>) -> (i32, i32, i32) {
    %c0_i32 = arith.constant 0 : i32
    %c0_i32_0 = arith.constant 0 : i32
    return %arg1, %arg0, %c0_i32 : i32, i32, i32
  }
  func.func @transform_2(%arg0: i32, %arg1: i32, %arg2: i32, %arg3: memref<4xi32, #tpu.memory_space<smem>>, %arg4: memref<4xi32, #tpu.memory_space<smem>>) -> (i32, i32, i32) {
    %c4_i32 = arith.constant 4 : i32
    %0 = arith.muli %arg0, %c4_i32 : i32
    %1 = arith.addi %0, %arg1 : i32
    %2 = arith.index_cast %1 : i32 to index
    %3 = memref.load %arg3[%2] : memref<4xi32, #tpu.memory_space<smem>>
    %c0_i32 = arith.constant 0 : i32
    %4 = arith.cmpi sgt, %3, %c0_i32 : i32
    %5 = arith.extui %4 : i1 to i32
    %6 = arith.index_cast %1 : i32 to index
    %7 = memref.load %arg4[%6] : memref<4xi32, #tpu.memory_space<smem>>
    %8 = arith.muli %5, %arg2 : i32
    %c1_i32 = arith.constant 1 : i32
    %9 = arith.subi %c1_i32, %5 : i32
    %c0_i32_0 = arith.constant 0 : i32
    %10 = arith.muli %9, %c0_i32_0 : i32
    %11 = arith.addi %8, %10 : i32
    %c0_i32_1 = arith.constant 0 : i32
    %c0_i32_2 = arith.constant 0 : i32
    return %7, %c0_i32_1, %11 : i32, i32, i32
  }
  func.func @transform_3(%arg0: i32, %arg1: i32, %arg2: i32, %arg3: memref<4xi32, #tpu.memory_space<smem>>, %arg4: memref<4xi32, #tpu.memory_space<smem>>) -> (i32, i32, i32) {
    %c4_i32 = arith.constant 4 : i32
    %0 = arith.muli %arg0, %c4_i32 : i32
    %1 = arith.addi %0, %arg1 : i32
    %2 = arith.index_cast %1 : i32 to index
    %3 = memref.load %arg3[%2] : memref<4xi32, #tpu.memory_space<smem>>
    %c0_i32 = arith.constant 0 : i32
    %4 = arith.cmpi sgt, %3, %c0_i32 : i32
    %5 = arith.extui %4 : i1 to i32
    %6 = arith.index_cast %1 : i32 to index
    %7 = memref.load %arg4[%6] : memref<4xi32, #tpu.memory_space<smem>>
    %8 = arith.muli %5, %arg2 : i32
    %c1_i32 = arith.constant 1 : i32
    %9 = arith.subi %c1_i32, %5 : i32
    %c0_i32_0 = arith.constant 0 : i32
    %10 = arith.muli %9, %c0_i32_0 : i32
    %11 = arith.addi %8, %10 : i32
    %c0_i32_1 = arith.constant 0 : i32
    %c0_i32_2 = arith.constant 0 : i32
    return %7, %11, %c0_i32_1 : i32, i32, i32
  }
  func.func @transform_4(%arg0: i32, %arg1: i32, %arg2: i32, %arg3: memref<4xi32, #tpu.memory_space<smem>>, %arg4: memref<4xi32, #tpu.memory_space<smem>>) -> (i32, i32) {
    %c0_i32 = arith.constant 0 : i32
    %c0_i32_0 = arith.constant 0 : i32
    return %arg0, %c0_i32 : i32, i32
  }
}

</mosaic_0001>

<bundles_post_ra>
// kernel: tpu_custom_call.1
= control target key start
LH: loop header
LB: loop body
LE: loop exit
PB: predicated region body
PF: predicated region fallthrough
CT: control target
= control target key end

     0   :  { %s1081_s0 = inlined_call_operand.vmem [shape: s32[4], index: 0, kind: input, shape index: {}]   ;;  %s1082_s2 = inlined_call_operand.vmem [shape: f32[8,32], index: 2, kind: input, shape index: {}]   ;;  %s1083_s3 = inlined_call_operand.vmem [shape: f32[4,8,1], index: 3, kind: input, shape index: {}]   ;;  %s1084_s4 = inlined_call_operand.vmem [shape: f32[4,32,128], index: 4, kind: input, shape index: {}]   ;;  %s1085_s5 = inlined_call_operand.vmem [shape: f32[4,64,32], index: 5, kind: input, shape index: {}]   ;;  %s1086_s6 = inlined_call_operand.hbm [shape: f32[8,32], index: 6, kind: output, shape index: {}]   ;;  %s1087_s1 = inlined_call_operand.vmem [shape: s32[4], index: 1, kind: input, shape index: {}]  }
   0x1   :  { %s11_s23 = sshll.u32 %s1081_s0, 4  ;;  %s15_s26 = sshll.u32 %s1087_s1, 4  ;;  %s12_s23 = int_to_ptr.vmem [resolvable:$true] %s11_s23  ;;  %s16_s26 = int_to_ptr.vmem [resolvable:$true] %s15_s26 }
   0x2   :  { %s862_s27 = scalar_lea.vmem %s12_s23, 16  ;;  %p867_p1 = scmp.lt.s32.totalorder %s12_s23, %s12_s23 }
   0x3   :  { %p863_p0 = scmp.ne.s32.totalorder %s12_s23, %s862_s27  ;;  %p868_p2 = scmp.lt.s32.totalorder %s862_s27, %s862_s27 }
   0x5   :  { %p869_p3 = por %p868_p2, %p867_p1 }
   0x7   :  { %p870_p4 = pnand %p869_p3, %p863_p0 }
   0x9   :  { %873 = shalt.err (!%p870_p4)  }
   0xa   :  { %s942_s28 = smov [#allocation4]   ;;  %s874_s29 = scalar_lea.vmem %s16_s26, 16 }
   0xb   :  { %14 = dma.vmem_to_smem %s12_s23, 16, %s942_s28, [#allocation3] }
   0xc   :  { %p875_p5 = scmp.ne.s32.totalorder %s16_s26, %s874_s29  ;;  %p879_p6 = scmp.lt.s32.totalorder %s16_s26, %s16_s26 }
   0xd   :  { %p880_p7 = scmp.lt.s32.totalorder %s874_s29, %s874_s29 }
   0xf   :  { %p881_p8 = por %p880_p7, %p879_p6 }
  0x11   :  { %p882_p9 = pnand %p881_p8, %p875_p5 }
  0x13   :  { %885 = shalt.err (!%p882_p9)  }
  0x14   :  { %s943_s0 = smov [#allocation5]  }
  0x15   :  { %18 = dma.vmem_to_smem %s16_s26, 16, %s943_s0, [#allocation3] }
  0x16   :  { %924 = dma.done.wait [#allocation3], 32 }
  0x17   :  { %925 = vsyncadd [#allocation3], 4294967264 }
  0x18   :  { %20 = sfence }
  0x19   :  { %21 = vsyncpa [#allocation7], 0  ;;  %s992_s1 = smov 0   ;;  %s994_s30 = smov 0  }
  0x1a   :  { %s996_s7 = smov 0  }
  0x1b LB: > { %s732_s8 = sadd.s32 4294967295, %s940_s7   ;;  %s42_s9 = sadd.s32 1, %s936_s30  ;;  %s940_s7 = sphi %s996_s7, %s27_s7   ;;  %s936_s30 = sphi %s994_s30, %s1090_s30   ;;  %s932_s1 = sphi %s992_s1, %s1089_s1  }
  0x1c   : > { %p44_p10 = scmp.ge.s32.totalorder %s42_s9, 4  ;;  %p736_p11 = scmp.ge.s32.totalorder %s940_s7, 1 }
  0x1d   : > { %p295_p12 = scmp.lt.s32.totalorder %s940_s7, 5 }
  0x1e   : > { %s1092_s9 = smov (%p44_p10, %s42_s9), 0 }
  0x1f   : > { %p296_p13 = pnand %p736_p11, %p295_p12 }
  0x20   : > { %p357_p0 = scmp.lt.s32.totalorder (!%p296_p13), %s932_s1, 3  ;;  %s369_s10 = sld [smem:[#allocation5 + %s932_s1]] (!%p296_p13) }
  0x21   : > { %299 = sbr.rel (%p296_p13) target bundleno = 648 (0x288), region = 36  ;;  %s391_s11 = sld [smem:[#allocation5 + %s932_s1]] (!%p296_p13) }
  0x22   : > { %p410_p1 = scmp.eq.s32.totalorder (!%p296_p13), %s932_s1, 0 }
  0x26   : > { %p371_p2 = scmp.lt.s32.totalorder (!%p296_p13), %s369_s10, 3 }
  0x27   : > { %p394_p3 = scmp.lt.s32.totalorder (!%p296_p13), %s391_s11, 3 }
  0x28   : > { %s358_s12 = scalar_select %p357_p0, %s932_s1, 3 }
  0x29   : > { %s1094_s10 = smov (!%p371_p2, %s369_s10), 3  ;;  %s1096_s11 = smov (!%p394_p3, %s391_s11), 3 }
  0x2a   : > { %s737_s13 = sshll.u32 %s358_s12, 3  ;;  %s752_s17 = sshll.u32 %s1094_s10, 5  ;;  %vm416_vm0 = vcmask (%p410_p1), 261120   ;;  %v944_v0 = vmov (%p410_p1), 0.0  }
  0x2b   : > { %s363_s16 = scalar_lea.vmem %s1083_s3, %s737_s13  ;;  %s378_s20 = scalar_lea.vmem %s1084_s4, %s752_s17  ;;  %417 = vst.msk [vmem:[#allocation2] sm:$0xff] (%p410_p1), %vm416_vm0, %v944_v0 }
  0x2c   : > { %s753_s21 = sshll.u32 %s1096_s11, 6  ;;  %415 = sbr.rel (!%p410_p1) target bundleno = 51 (0x33), region = 40 }
  0x2d   : > { %s1027_s24 = scalar_lea.vmem %s1085_s5, %s753_s21 }
  0x33 PF: > { %s420_s25 = sld [smem:[#allocation4 + %s932_s1]] }
  0x39   : > { %p743_p4 = scmp.le.s32.totalorder %s420_s25, 0 }
  0x3a   : > { %v426_v1 = vld [vmem:[%s378_s20] sm:$0xff] (!%p743_p4)  ;;  %v427_v2 = vld [vmem:[%s378_s20 + $0x8] sm:$0xff] (!%p743_p4)  ;;  %v428_v3 = vld [vmem:[%s378_s20 + $0x10] sm:$0xff] (!%p743_p4)  ;;  %v945_v4 = vmov (!%p743_p4), 0.0|0.0   ;;  %vm946_vm1 = vmmov (!%p743_p4), 0   ;;  %v947_v7 = vmov (!%p743_p4), 0.0  }
  0x3b   : > { %424 = sbr.rel (%p743_p4) target bundleno = 614 (0x266), region = 44  ;;  %800 = vmatprep.subr.bf16.mxu0 (!%p743_p4), %v945_v4  ;;  %v801_v5 = vpack.c.bf16 (!%p743_p4), %v427_v2, %v426_v1  ;;  %v429_v6 = vld [vmem:[%s378_s20 + $0x18] sm:$0xff] (!%p743_p4)  ;;  %778 = vmatprep.mubr.msk.f32.mxu0 (!%p743_p4), %vm946_vm1, %v947_v7  ;;  %v516_v8 = vld [vmem:[%s363_s16] sm:$0xff] (!%p743_p4)  ;;  %v948_v9 = vmov (!%p743_p4), 0   ;;  %vm430_vm2 = vcmask (!%p743_p4), 261120   ;;  %v525_v13 = vld [vmem:[%s1027_s24 + $0x8] sm:$0xff] (!%p743_p4) }
  0x3c   : > { %857 = vset.pattern.permute.xlu0 (!%p743_p4), %v948_v9  ;;  %806 = vmatprep.subr.bf16.mxu1 (!%p743_p4), %v945_v4  ;;  %v804_v10 = vpack.c.bf16 (!%p743_p4), %v429_v6, %v428_v3  ;;  %v425_v11 = vld [vmem:[%s1082_s2] sm:$0xff] (!%p743_p4)  ;;  %v526_v14 = vld [vmem:[%s1027_s24 + $0x10] sm:$0xff] (!%p743_p4)  ;;  %v527_v16 = vld [vmem:[%s1027_s24 + $0x18] sm:$0xff] (!%p743_p4)  ;;  %s949_s28 = smov (!%p743_p4), 64   ;;  %vm532_vm3 = vcmask (!%p743_p4), 523264  }
  0x3d   : > { %802 = vmatpush3.bf16.msra.mxu0 (!%p743_p4), %v801_v5  ;;  %519 = vperm.xlu0 (!%p743_p4), %857, %v516_v8   ;;  %v524_v12 = vld [vmem:[%s1027_s24] sm:$0xff] (!%p743_p4)  ;;  %v810_v17 = vpack.c.bf16 (!%p743_p4), %v527_v16, %v526_v14  ;;  %v529_v19 = vld [vmem:[%s1027_s24 + $0x28] sm:$0xff] (!%p743_p4)  ;;  %v530_v21 = vld [vmem:[%s1027_s24 + $0x30] sm:$0xff] (!%p743_p4) }
  0x3e   : > { %803 = vmatprep.subr.bf16.mxu0 (!%p743_p4), %v945_v4  ;;  %797 = vmatprep.mubr.msk.f32.mxu1 (!%p743_p4), %vm946_vm1, %v947_v7  ;;  %v807_v15 = vpack.c.bf16 (!%p743_p4), %v525_v13, %v524_v12  ;;  %v528_v18 = vld [vmem:[%s1027_s24 + $0x20] sm:$0xff] (!%p743_p4)  ;;  %v531_v22 = vld [vmem:[%s1027_s24 + $0x38] sm:$0xff] (!%p743_p4) }
  0x3f   : > { %v813_v20 = vpack.c.bf16 (!%p743_p4), %v529_v19, %v528_v18  ;;  %v816_v23 = vpack.c.bf16 (!%p743_p4), %v531_v22, %v530_v21  ;;  %v523_v35 = vld [vmem:[#allocation2] sm:$0xff] (!%p743_p4) }
  0x40   : > { %808 = vmatpush3.bf16.msra.mxu1 (!%p743_p4), %v807_v15 }
  0x41   : > { %805 = vmatpush3.bf16.msra.mxu0 (!%p743_p4), %v804_v10  ;;  %809 = vmatprep.subr.bf16.mxu1 (!%p743_p4), %v945_v4 }
  0x44   : > { %779 = vmatmul.mubr.msk.f32.vlgmr.msra.gmra.mrb[0].mxu0 %vm430_vm2, %v425_v11  ;;  %811 = vmatpush3.bf16.msra.mxu1 %v810_v17 }
  0x45   : > { %812 = vmatprep.subr.bf16.mxu1 %v945_v4 }
  0x48   : > { %814 = vmatpush3.bf16.msra.mxu1 %v813_v20 }
  0x49   : > { %815 = vmatprep.subr.bf16.mxu1 %v945_v4 }
  0x4c   : > { %817 = vmatpush3.bf16.msra.mxu1 %v816_v23 }
  0xbc   : > { %v520_v29 = vpop.permute.xlu0 %519 }
 0x117   : > { %v500_v24 = vpop.f32.mrb[0].mxu0 }
 0x118   : > { %512 = vrot.lane.b32.xlu0 %v500_v24, %s949_s28  ;;  %v780_v25 = vpop.f32.mrb[1].mxu0  ;;  %v745_v26 = vmul.f32 -1.442695, %v500_v24 }
 0x11a   : > { %858 = vpow2.f32 %v745_v26 }
 0x124   : > { %v859_v27 = vpop.eup %858 }
 0x125   : > { %v507_v28 = vadd.f32 1.0, %v859_v27 }
 0x127   : > { %860 = vrcp.f32 %v507_v28 }
 0x131   : > { %v861_v30 = vpop.eup %860 }
 0x132   : > { %v510_v31 = vmul.f32 %v861_v30, %v500_v24 }
 0x18a   : > { %v513_v32 = vpop.permute.xlu0 %512 }
 0x18b   : > { %v515_v33 = vmul.f32 %v513_v32, %v510_v31 }
 0x18d   : > { %v522_v34 = vmul.f32 %v520_v29, %v515_v33 }
 0x18f   : > { %798 = vmatmul.mubr.msk.f32.vlgmr.msra.gmra.mrb[0].mxu1 %vm532_vm3, %v522_v34 }
 0x262   : > { %v602_v36 = vpop.f32.mrb[0].mxu1 }
 0x263   : > { %v606_v37 = vadd.f32 %v602_v36, %v523_v35  ;;  %v799_v38 = vpop.f32.mrb[1].mxu1 }
 0x265   : > { %607 = vst.msk [vmem:[#allocation2] sm:$0xff] %vm430_vm2, %v606_v37 }
 0x266 PF: > { %p608_p5 = scmp.eq.s32.totalorder %s932_s1, 3 }
 0x267   : > { %vm614_vm4 = vcmask (%p608_p5), 261120  }
 0x268   : > { %612 = sbr.rel (!%p608_p5) target bundleno = 623 (0x26f), region = 48 }
 0x26c   : > { %v613_v39 = vld [vmem:[#allocation2] sm:$0xff] (%p608_p5) }
 0x26d   : > { %615 = vst.msk [vmem:[#allocation6] sm:$0xff] (%p608_p5), %vm614_vm4, %v613_v39 }
 0x26f PF: > { %p1046_p6 = scmp.eq.s32.totalorder %s732_s8, 3  ;;  %s950_s0 = smov [#allocation6]  }
 0x270   : > { %s625_s10 = sshll.u32 %s950_s0, 4  ;;  %s626_s10 = int_to_ptr.vmem [resolvable:$true] %s625_s10 }
 0x271   : > { %s886_s11 = scalar_lea.vmem %s626_s10, 128  ;;  %p893_p10 = scmp.lt.s32.totalorder %s626_s10, %s626_s10 }
 0x272   : > { %p887_p7 = scmp.ne.s32.totalorder %s626_s10, %s886_s11  ;;  %p894_p11 = scmp.lt.s32.totalorder %s886_s11, %s886_s11 }
 0x274   : > { %p888_p8 = pnand %p887_p7, %p1046_p6  ;;  %p895_p12 = por %p894_p11, %p893_p10 }
 0x276   : > { %p889_p9 = pneg %p888_p8 }
 0x278   : > { %p896_p13 = pnand %p895_p12, %p889_p9 }
 0x27a   : > { %899 = shalt.err (!%p896_p13)
}
 0x27b   : > { %s900_s8 = scalar_lea.hbm %s1086_s6, 128 }
 0x27c   : > { %p901_p0 = scmp.ne.s32.totalorder %s1086_s6, %s900_s8  ;;  %p906_p3 = scmp.lt.u32.totalorder %s900_s8, %s1086_s6 }
 0x27e   : > { %p902_p1 = pnand %p901_p0, %p1046_p6 }
 0x280   : > { %p903_p2 = pneg %p902_p1 }
 0x282   : > { %p908_p4 = pnand %p906_p3, %p903_p2 }
 0x284   : > { %911 = shalt.err (!%p908_p4)
}
 0x285   : > { %819 = dma.vmem_to_hbm [thread:$0]  (%p1046_p6), %s626_s10, 128, %s1086_s6, [#allocation7]  }
 0x286   : > { %927 = dma.done.wait (%p1046_p6), [#allocation7], 128  }
 0x287   : > { %929 = vsyncadd (%p1046_p6), [#allocation7], 4294967168 }
 0x288 PF: > { %s27_s7 = sadd.s32 1, %s940_s7   ;;  %s1089_s1 = smov %s936_s30 }
 0x289   : > { %p24_p5 = scmp.ge.s32.totalorder %s27_s7, 6   ;;  %s1090_s30 = smov %s1092_s9 }
 0x28b   :  { %26 = sbr.rel (!%p24_p5) target bundleno = 27 (0x1b), region = 85 }
 0x292   :  { %638 = vsyncpa [#allocation7], 1 }
 0x293   :  { %640 = vsyncpa [#allocation7 + $0x1], 1 }

</bundles_post_ra>
